<compile_context>
chip_gen: v5e
topology: v5e:2x2
jax: 0.10.0
libtpu: 0.0.40
codegen_flags: <defaults>
</compile_context>

<pallas_src>
import functools

import jax
import jax.numpy as jnp
from jax.experimental import pallas as pl
from jax.experimental.pallas import tpu as pltpu

_LANE = 128
_SUBLANE = 8
_NEG_BIG = -1e30  # padded-vocab bias; exp() underflows to exactly 0


def _round_up(x, m):
    return ((x + m - 1) // m) * m


def _decoder_step_kernel(xh_ref, h0_ref, wg_ref, bg_ref, wout_ref, bout_ref,
                         logp_ref, hnew_ref, *, h_pad):
    Hp = h_pad

    # One fused gate matmul (bf16 x bf16 -> f32 accumulate).  Column blocks:
    #   [0:Hp)    r preact  = W_ir x + W_hr h   (bias b_ir + b_hr)
    #   [Hp:2Hp)  z preact  = W_iz x + W_hz h   (bias b_iz + b_hz)
    #   [2Hp:3Hp) i_n       = W_in x            (bias b_in)
    #   [3Hp:4Hp) h_n       = W_hn h            (bias b_hn)
    gates = jnp.dot(xh_ref[...], wg_ref[...],
                    preferred_element_type=jnp.float32) + bg_ref[...]

    r = jax.nn.sigmoid(gates[:, 0:Hp])
    z = jax.nn.sigmoid(gates[:, Hp:2 * Hp])
    n = jnp.tanh(gates[:, 2 * Hp:3 * Hp] + r * gates[:, 3 * Hp:4 * Hp])

    h_prev = h0_ref[...]                          # f32 (Bp, Hp)
    h_new = (1.0 - z) * n + z * h_prev            # gate math stays f32 (v5e-safe)
    hnew_ref[...] = h_new

    # Output projection + numerically stable log-softmax.  Padded vocab lanes
    # carry a -1e30 bias -> exp() == 0, so they do not perturb max/sum.
    logits = jnp.dot(h_new.astype(wout_ref.dtype), wout_ref[...],
                     preferred_element_type=jnp.float32) + bout_ref[...]
    m = jnp.max(logits, axis=-1, keepdims=True)
    lse = jnp.log(jnp.sum(jnp.exp(logits - m), axis=-1, keepdims=True)) + m
    logp_ref[...] = logits - lse


def pack_params(params):
    """One-time packing: transpose, pad to lane/sublane-aligned shapes, fuse the
    two GRU gate matmuls into one stacked weight, cast weights to bf16."""
    emb = params["embedding"]                      # (V, E)
    w_ih = params["w_ih"]                          # (3H, E)  rows [r|z|n]
    w_hh = params["w_hh"]                          # (3H, H)  rows [r|z|n]
    b_ih = jnp.reshape(params["b_ih"], (-1,))      # (3H,)
    b_hh = jnp.reshape(params["b_hh"], (-1,))      # (3H,)
    w_out = params["w_out"]                        # (V, H)
    b_out = jnp.reshape(params["b_out"], (-1,))    # (V,)

    V, E = emb.shape
    H = w_hh.shape[1]
    Ep = _round_up(E, _LANE)
    Hp = _round_up(H, _LANE)
    Vp = _round_up(V, _LANE)

    def gate(w, g):  # g: 0=r, 1=z, 2=n
        return w[g * H:(g + 1) * H]

    # Stacked, pre-transposed gate weight: (Ep + Hp, 4*Hp).
    wg = jnp.zeros((Ep + Hp, 4 * Hp), jnp.float32)
    # r and z: both input rows (W_i*) and hidden rows (W_h*) feed the same columns.
    wg = wg.at[:E, 0 * Hp:0 * Hp + H].set(gate(w_ih, 0).T)
    wg = wg.at[Ep:Ep + H, 0 * Hp:0 * Hp + H].set(gate(w_hh, 0).T)
    wg = wg.at[:E, 1 * Hp:1 * Hp + H].set(gate(w_ih, 1).T)
    wg = wg.at[Ep:Ep + H, 1 * Hp:1 * Hp + H].set(gate(w_hh, 1).T)
    # n gate: i_n from input rows only, h_n from hidden rows only (kept separate
    # because PyTorch applies r inside the tanh: tanh(i_n + r * h_n)).
    wg = wg.at[:E, 2 * Hp:2 * Hp + H].set(gate(w_ih, 2).T)
    wg = wg.at[Ep:Ep + H, 3 * Hp:3 * Hp + H].set(gate(w_hh, 2).T)

    bg = jnp.zeros((1, 4 * Hp), jnp.float32)
    bg = bg.at[0, 0 * Hp:0 * Hp + H].set(b_ih[0:H] + b_hh[0:H])
    bg = bg.at[0, 1 * Hp:1 * Hp + H].set(b_ih[H:2 * H] + b_hh[H:2 * H])
    bg = bg.at[0, 2 * Hp:2 * Hp + H].set(b_ih[2 * H:3 * H])
    bg = bg.at[0, 3 * Hp:3 * Hp + H].set(b_hh[2 * H:3 * H])

    wout_t = jnp.zeros((Hp, Vp), jnp.float32).at[:H, :V].set(w_out.T)
    bout_p = jnp.full((1, Vp), _NEG_BIG, jnp.float32).at[0, :V].set(b_out)

    packed = {
        "embedding": emb.astype(jnp.bfloat16),
        "wg": wg.astype(jnp.bfloat16),
        "bg": bg,
        "wout_t": wout_t.astype(jnp.bfloat16),
        "bout": bout_p,
    }
    dims = (V, E, H, Vp, Ep, Hp)
    return packed, dims


@functools.partial(jax.jit, static_argnums=(3,))
def decoder_forward(tokens, hidden, packed, dims):
    """tokens: (B,) int32; hidden: (1, B, H) f32.
    Returns (output, hidden): output (B, 1, V) log-probs, hidden (1, B, H)."""
    V, E, H, Vp, Ep, Hp = dims
    B = tokens.shape[0]
    Bp = _round_up(B, _SUBLANE)

    # Glue: embedding gather (input.unsqueeze(1) -> embedding); dropout is a
    # no-op in eval / p=0.0.
    x = jnp.take(packed["embedding"], tokens, axis=0)        # (B, E) bf16
    h0 = hidden[0]                                           # (B, H) f32

    # Lane/sublane-aligned slabs for the kernel.
    xh = jnp.zeros((Bp, Ep + Hp), jnp.bfloat16)
    xh = xh.at[:B, :E].set(x)
    xh = xh.at[:B, Ep:Ep + H].set(h0.astype(jnp.bfloat16))
    h0p = jnp.zeros((Bp, Hp), jnp.float32).at[:B, :H].set(h0)

    vmem = pl.BlockSpec(memory_space=pltpu.MemorySpace.VMEM)
    kernel = functools.partial(_decoder_step_kernel, h_pad=Hp)

    logp, h_new = pl.pallas_call(
        kernel,
        out_shape=(
            jax.ShapeDtypeStruct((Bp, Vp), jnp.float32),
            jax.ShapeDtypeStruct((Bp, Hp), jnp.float32),
        ),
        in_specs=[vmem] * 6,
        out_specs=(vmem, vmem),
        input_output_aliases={1: 1},   # h0 buffer is reused in place for h_new
    )(xh, h0p, packed["wg"], packed["bg"], packed["wout_t"], packed["bout"])

    output = logp[:B, :V][:, None, :]     # (B, 1, V) — batch_first, seq_len = 1
    new_hidden = h_new[:B, :H][None]      # (1, B, H) — numLayers=1, unidirectional
    return output, new_hidden


def init_params(key, output_size, embed_size, hidden_size):
    ks = jax.random.split(key, 7)
    s = 0.1
    return {
        "embedding": jax.random.normal(ks[0], (output_size, embed_size), jnp.float32) * s,
        "w_ih": jax.random.normal(ks[1], (3 * hidden_size, embed_size), jnp.float32) * s,
        "w_hh": jax.random.normal(ks[2], (3 * hidden_size, hidden_size), jnp.float32) * s,
        "b_ih": jax.random.normal(ks[3], (1, 3 * hidden_size), jnp.float32) * s,
        "b_hh": jax.random.normal(ks[4], (1, 3 * hidden_size), jnp.float32) * s,
        "w_out": jax.random.normal(ks[5], (output_size, hidden_size), jnp.float32) * s,
        "b_out": jax.random.normal(ks[6], (1, output_size), jnp.float32) * s,
    }


def _reference_forward(tokens, hidden, params):
    """Pure-JAX f32 reference matching the PyTorch module."""
    x = jnp.take(params["embedding"], tokens, axis=0)
    h = hidden[0]
    H = params["w_hh"].shape[1]
    gi = x @ params["w_ih"].T + params["b_ih"]
    gh = h @ params["w_hh"].T + params["b_hh"]
    r = jax.nn.sigmoid(gi[:, :H] + gh[:, :H])
    z = jax.nn.sigmoid(gi[:, H:2 * H] + gh[:, H:2 * H])
    n = jnp.tanh(gi[:, 2 * H:] + r * gh[:, 2 * H:])
    h_new = (1.0 - z) * n + z * h
    logits = h_new @ params["w_out"].T + params["b_out"]
    return jax.nn.log_softmax(logits, axis=-1)[:, None, :], h_new[None]


if __name__ == "__main__":
    # Config: typ='GRU', numLayers=1, bidirectional=False, dropout=0.0 (eval).
    OUTPUT_SIZE = 32   # vocab
    EMBED_SIZE = 16
    HIDDEN_SIZE = 32
    BATCH = 4

    key = jax.random.PRNGKey(0)
    k_par, k_tok, k_hid = jax.random.split(key, 3)

    raw_params = init_params(k_par, OUTPUT_SIZE, EMBED_SIZE, HIDDEN_SIZE)
    packed, dims = pack_params(raw_params)

    tokens = jax.random.randint(k_tok, (BATCH,), 0, OUTPUT_SIZE, dtype=jnp.int32)
    hidden0 = jax.random.normal(k_hid, (1, BATCH, HIDDEN_SIZE), jnp.float32)  # initHidden

    output, hidden1 = decoder_forward(tokens, hidden0, packed, dims)
    jax.block_until_ready((output, hidden1))

    assert output.shape == (BATCH, 1, OUTPUT_SIZE)
    assert hidden1.shape == (1, BATCH, HIDDEN_SIZE)
    # log-softmax rows should sum to ~1 in prob space
    assert bool(jnp.allclose(jnp.sum(jnp.exp(output), axis=-1), 1.0, atol=1e-3))

    # Check against the pure-f32 reference (bf16 weights -> loose tolerance).
    ref_out, ref_hid = _reference_forward(tokens, hidden0, raw_params)
    assert bool(jnp.allclose(output, ref_out, atol=5e-2))
    assert bool(jnp.allclose(hidden1, ref_hid, atol=5e-2))

    print("KERNEL_OK")
</pallas_src>

<mosaic_0001>
module attributes {stable_mosaic.version = 11 : i64} {
  func.func @_decoder_step_kernel(%arg0: memref<8x256xbf16, #tpu.memory_space<vmem>>, %arg1: memref<8x128xf32, #tpu.memory_space<vmem>>, %arg2: memref<256x512xbf16, #tpu.memory_space<vmem>>, %arg3: memref<1x512xf32, #tpu.memory_space<vmem>>, %arg4: memref<128x128xbf16, #tpu.memory_space<vmem>>, %arg5: memref<1x128xf32, #tpu.memory_space<vmem>>, %arg6: memref<8x128xf32, #tpu.memory_space<vmem>>, %arg7: memref<8x128xf32, #tpu.memory_space<vmem>>) attributes {dimension_semantics = [], scalar_prefetch = 0 : i64, scratch_operands = 0 : i64, tpu.core_type = #tpu.core_type<tc>} {
    %c0 = arith.constant 0 : index
    %c0_0 = arith.constant 0 : index
    %0 = vector.load %arg0[%c0, %c0_0] : memref<8x256xbf16, #tpu.memory_space<vmem>>, vector<8x256xbf16>
    %c0_1 = arith.constant 0 : index
    %c0_2 = arith.constant 0 : index
    %1 = vector.load %arg2[%c0_1, %c0_2] : memref<256x512xbf16, #tpu.memory_space<vmem>>, vector<256x512xbf16>
    %cst = arith.constant dense<0.000000e+00> : vector<8x512xf32>
    %2 = tpu.matmul %0, %1, %cst {dimension_numbers = #tpu.dot_dimension_numbers<[1], [0], [0], [1], [0, 0, 1, 1], [], []>} : vector<8x256xbf16>, vector<256x512xbf16>, vector<8x512xf32> -> vector<8x512xf32>
    %c0_3 = arith.constant 0 : index
    %c0_4 = arith.constant 0 : index
    %3 = vector.load %arg3[%c0_3, %c0_4] : memref<1x512xf32, #tpu.memory_space<vmem>>, vector<1x512xf32>
    %4 = vector.broadcast %3 : vector<1x512xf32> to vector<8x512xf32>
    %5 = arith.addf %2, %4 : vector<8x512xf32>
    %6 = vector.extract_strided_slice %5 {offsets = [0, 0], sizes = [8, 128], strides = [1, 1]} : vector<8x512xf32> to vector<8x128xf32>
    %7 = arith.negf %6 : vector<8x128xf32>
    %8 = math.exp %7 : vector<8x128xf32>
    %cst_5 = arith.constant 1.000000e+00 : f32
    %9 = vector.broadcast %cst_5 : f32 to vector<8x128xf32>
    %10 = arith.addf %9, %8 : vector<8x128xf32>
    %11 = arith.divf %9, %10 : vector<8x128xf32>
    %12 = vector.extract_strided_slice %5 {offsets = [0, 128], sizes = [8, 128], strides = [1, 1]} : vector<8x512xf32> to vector<8x128xf32>
    %13 = arith.negf %12 : vector<8x128xf32>
    %14 = math.exp %13 : vector<8x128xf32>
    %cst_6 = arith.constant 1.000000e+00 : f32
    %15 = vector.broadcast %cst_6 : f32 to vector<8x128xf32>
    %16 = arith.addf %15, %14 : vector<8x128xf32>
    %17 = arith.divf %15, %16 : vector<8x128xf32>
    %18 = vector.extract_strided_slice %5 {offsets = [0, 256], sizes = [8, 128], strides = [1, 1]} : vector<8x512xf32> to vector<8x128xf32>
    %19 = vector.extract_strided_slice %5 {offsets = [0, 384], sizes = [8, 128], strides = [1, 1]} : vector<8x512xf32> to vector<8x128xf32>
    %20 = arith.mulf %11, %19 : vector<8x128xf32>
    %21 = arith.addf %18, %20 : vector<8x128xf32>
    %22 = math.tanh %21 : vector<8x128xf32>
    %c0_7 = arith.constant 0 : index
    %c0_8 = arith.constant 0 : index
    %23 = vector.load %arg1[%c0_7, %c0_8] : memref<8x128xf32, #tpu.memory_space<vmem>>, vector<8x128xf32>
    %cst_9 = arith.constant 1.000000e+00 : f32
    %24 = vector.broadcast %cst_9 : f32 to vector<8x128xf32>
    %25 = arith.subf %24, %17 : vector<8x128xf32>
    %26 = arith.mulf %25, %22 : vector<8x128xf32>
    %27 = arith.mulf %17, %23 : vector<8x128xf32>
    %28 = arith.addf %26, %27 : vector<8x128xf32>
    %c0_10 = arith.constant 0 : index
    %c0_11 = arith.constant 0 : index
    %29 = vector.load %arg7[%c0_10, %c0_11] : memref<8x128xf32, #tpu.memory_space<vmem>>, vector<8x128xf32>
    tpu.vector_store %arg7[%c0_10, %c0_11], %28 {strides = array<i32>} : memref<8x128xf32, #tpu.memory_space<vmem>>, vector<8x128xf32>,
    %30 = arith.truncf %28 : vector<8x128xf32> to vector<8x128xbf16>
    %c0_12 = arith.constant 0 : index
    %c0_13 = arith.constant 0 : index
    %31 = vector.load %arg4[%c0_12, %c0_13] : memref<128x128xbf16, #tpu.memory_space<vmem>>, vector<128x128xbf16>
    %cst_14 = arith.constant dense<0.000000e+00> : vector<8x128xf32>
    %32 = tpu.matmul %30, %31, %cst_14 {dimension_numbers = #tpu.dot_dimension_numbers<[1], [0], [0], [1], [0, 0, 1, 1], [], []>} : vector<8x128xbf16>, vector<128x128xbf16>, vector<8x128xf32> -> vector<8x128xf32>
    %c0_15 = arith.constant 0 : index
    %c0_16 = arith.constant 0 : index
    %33 = vector.load %arg5[%c0_15, %c0_16] : memref<1x128xf32, #tpu.memory_space<vmem>>, vector<1x128xf32>
    %34 = vector.broadcast %33 : vector<1x128xf32> to vector<8x128xf32>
    %35 = arith.addf %32, %34 : vector<8x128xf32>
    %cst_17 = arith.constant dense<0xFF800000> : vector<8xf32>
    %36 = vector.multi_reduction <maximumf>, %35, %cst_17 [1] : vector<8x128xf32> to vector<8xf32>
    %37 = vector.shape_cast %36 : vector<8xf32> to vector<8x1xf32>
    %38 = vector.broadcast %37 : vector<8x1xf32> to vector<8x128xf32>
    %39 = arith.subf %35, %38 : vector<8x128xf32>
    %40 = math.exp %39 : vector<8x128xf32>
    %cst_18 = arith.constant dense<0.000000e+00> : vector<8xf32>
    %41 = vector.multi_reduction <add>, %40, %cst_18 [1] : vector<8x128xf32> to vector<8xf32>
    %42 = vector.shape_cast %41 : vector<8xf32> to vector<8x1xf32>
    %43 = math.log %42 : vector<8x1xf32>
    %44 = arith.addf %43, %37 : vector<8x1xf32>
    %45 = vector.broadcast %44 : vector<8x1xf32> to vector<8x128xf32>
    %46 = arith.subf %35, %45 : vector<8x128xf32>
    %c0_19 = arith.constant 0 : index
    %c0_20 = arith.constant 0 : index
    %47 = vector.load %arg6[%c0_19, %c0_20] : memref<8x128xf32, #tpu.memory_space<vmem>>, vector<8x128xf32>
    tpu.vector_store %arg6[%c0_19, %c0_20], %46 {strides = array<i32>} : memref<8x128xf32, #tpu.memory_space<vmem>>, vector<8x128xf32>,
    return
  }
}

</mosaic_0001>

<bundles_post_ra>
// kernel: decoder_forward.1
= control target key start
LH: loop header
LB: loop body
LE: loop exit
PB: predicated region body
PF: predicated region fallthrough
CT: control target
= control target key end

     0   :  { %13 = vsyncpa [#allocation3], 0  ;;  %s1231_s0 = inlined_call_operand.vmem [shape: bf16[8,256], index: 0, kind: input, shape index: {}]   ;;  %s1232_s1 = inlined_call_operand.vmem [shape: f32[8,128], index: 1, kind: input, shape index: {}, may-alias: {1,7}]   ;;  %s1233_s2 = inlined_call_operand.hbm [shape: bf16[256,512], index: 2, kind: input, shape index: {}]   ;;  %s1234_s3 = inlined_call_operand.vmem [shape: f32[1,512], index: 3, kind: input, shape index: {}]   ;;  %s1235_s4 = inlined_call_operand.hbm [shape: bf16[128,128], index: 4, kind: input, shape index: {}]   ;;  %s1236_s5 = inlined_call_operand.vmem [shape: f32[1,128], index: 5, kind: input, shape index: {}]   ;;  %s1237_s6 = inlined_call_operand.vmem [shape: f32[8,128], index: 6, kind: output, shape index: {0}]   ;;  %s1238_s7 = inlined_call_operand.vmem [shape: f32[8,128], index: 7, kind: output, shape index: {1}, may-alias: {1,7}]  }
   0x1   :  { %s23_s26 = sshll.u32 %s1233_s2, 4  ;;  %s24_s26 = int_to_ptr.hbm [resolvable:$true] %s23_s26 }
   0x2   :  { %14 = vsyncpa [#allocation5], 0  ;;  %s1149_s27 = smov [#allocation2]   ;;  %s38_s8 = sshll.u32 %s1235_s4, 4  ;;  %s39_s8 = int_to_ptr.hbm [resolvable:$true] %s38_s8 }
   0x3   :  { %s25_s28 = sshll.u32 %s1149_s27, 4  ;;  %s1150_s9 = smov 256   ;;  %s26_s28 = int_to_ptr.vmem [resolvable:$true] %s25_s28 }
   0x4   :  { %s1151_s10 = smov 16   ;;  %s1152_s11 = smov [#allocation4]  }
   0x5   :  { %31 = dma.hbm_to_vmem [thread:$0]  %s24_s26, 8192, %s26_s28, [#allocation3], %s1150_s9, %s1150_s9, %s1151_s10  }
   0x6   :  { %s40_s12 = sshll.u32 %s1152_s11, 4  ;;  %s1153_s13 = smov 64   ;;  %s41_s12 = int_to_ptr.vmem [resolvable:$true] %s40_s12 }
   0x7   :  { %s1154_s14 = smov 4  }
   0x8   :  { %46 = dma.hbm_to_vmem [thread:$0]  %s39_s8, 1024, %s41_s12, [#allocation5], %s1153_s13, %s1153_s13, %s1154_s14  }
   0x9   :  { %1145 = dma.done.wait [#allocation3], 8192  }
   0xa   :  { %1146 = vsyncadd [#allocation3], 4294959104 }
   0xb   :  { %1147 = dma.done.wait [#allocation5], 1024  }
   0xc   :  { %1148 = vsyncadd [#allocation5], 4294966272  ;;  %v828_v0 = vld [vmem:[#allocation2 + $0xe0] sm:$0xf]  ;;  %v1034_v1 = vld [vmem:[#allocation2 + $0xec] sm:$0xf0] }
   0xd   :  { %v1032_v2 = vld [vmem:[#allocation2 + $0xe4] sm:$0xf]  ;;  %v829_v3 = vor.u32 %v1034_v1, %v828_v0  ;;  %v830_v4 = vld [vmem:[#allocation2 + $0xf0] sm:$0xf0]  ;;  %v956_v9 = vld [vmem:[#allocation2 + $0x1e0] sm:$0xf] }
   0xe   :  { %v1064_v5 = vld [vmem:[#allocation2 + $0x1e4] sm:$0xf]  ;;  %v958_v6 = vld [vmem:[#allocation2 + $0x1f0] sm:$0xf0]  ;;  %v833_v7 = vor.u32 %v1032_v2, %v830_v4  ;;  %v1066_v10 = vld [vmem:[#allocation2 + $0x1ec] sm:$0xf0] }
   0xf   :  { %v961_v8 = vor.u32 %v1064_v5, %v958_v6  ;;  %v812_v11 = vld [vmem:[#allocation2 + $0xc0] sm:$0xf]  ;;  %459 = vmatpush.bf16.msra.mxu0 %v829_v3  ;;  %v957_v12 = vor.u32 %v1066_v10, %v956_v9  ;;  %v1030_v13 = vld [vmem:[#allocation2 + $0xcc] sm:$0xf0]  ;;  %v1028_v14 = vld [vmem:[#allocation2 + $0xc4] sm:$0xf] }
  0x10   :  { %v814_v15 = vld [vmem:[#allocation2 + $0xd0] sm:$0xf0]  ;;  %485 = vmatpush.bf16.msra.mxu2 %v833_v7  ;;  %v813_v16 = vor.u32 %v1030_v13, %v812_v11  ;;  %v1060_v18 = vld [vmem:[#allocation2 + $0x1c4] sm:$0xf]  ;;  %v940_v20 = vld [vmem:[#allocation2 + $0x1c0] sm:$0xf] }
  0x11   :  { %498 = vmatpush.bf16.msra.mxu3 %v961_v8  ;;  %v817_v17 = vor.u32 %v1028_v14, %v814_v15  ;;  %v942_v19 = vld [vmem:[#allocation2 + $0x1d0] sm:$0xf0]  ;;  %472 = vmatpush.bf16.msra.mxu1 %v957_v12  ;;  %v1062_v22 = vld [vmem:[#allocation2 + $0x1cc] sm:$0xf0]  ;;  %v796_v23 = vld [vmem:[#allocation2 + $0xa0] sm:$0xf] }
  0x12   :  { %v945_v21 = vor.u32 %v1060_v18, %v942_v19  ;;  %v1026_v24 = vld [vmem:[#allocation2 + $0xac] sm:$0xf0]  ;;  %v941_v25 = vor.u32 %v1062_v22, %v940_v20  ;;  %v1024_v26 = vld [vmem:[#allocation2 + $0xa4] sm:$0xf]  ;;  %v798_v27 = vld [vmem:[#allocation2 + $0xb0] sm:$0xf0] }
  0x13   :  { %v1056_v28 = vld [vmem:[#allocation2 + $0x1a4] sm:$0xf]  ;;  %460 = vmatpush.bf16.msra.mxu0 %v813_v16  ;;  %v797_v29 = vor.u32 %v1026_v24, %v796_v23  ;;  %v926_v30 = vld [vmem:[#allocation2 + $0x1b0] sm:$0xf0]  ;;  %v924_v31 = vld [vmem:[#allocation2 + $0x1a0] sm:$0xf]  ;;  %v801_v33 = vor.u32 %v1024_v26, %v798_v27 }
  0x14   :  { %v1058_v32 = vld [vmem:[#allocation2 + $0x1ac] sm:$0xf0]  ;;  %486 = vmatpush.bf16.msra.mxu2 %v817_v17  ;;  %v929_v34 = vor.u32 %v1056_v28, %v926_v30  ;;  %v780_v35 = vld [vmem:[#allocation2 + $0x80] sm:$0xf]  ;;  %v1020_v37 = vld [vmem:[#allocation2 + $0x84] sm:$0xf] }
  0x15   :  { %499 = vmatpush.bf16.msra.mxu3 %v945_v21  ;;  %v1022_v36 = vld [vmem:[#allocation2 + $0x8c] sm:$0xf0]  ;;  %473 = vmatpush.bf16.msra.mxu1 %v941_v25  ;;  %v925_v38 = vor.u32 %v1058_v32, %v924_v31  ;;  %v782_v39 = vld [vmem:[#allocation2 + $0x90] sm:$0xf0]  ;;  %v1052_v40 = vld [vmem:[#allocation2 + $0x184] sm:$0xf] }
  0x16   :  { %v910_v41 = vld [vmem:[#allocation2 + $0x190] sm:$0xf0]  ;;  %v908_v42 = vld [vmem:[#allocation2 + $0x180] sm:$0xf]  ;;  %v1054_v43 = vld [vmem:[#allocation2 + $0x18c] sm:$0xf0]  ;;  %v781_v44 = vor.u32 %v1022_v36, %v780_v35  ;;  %v785_v45 = vor.u32 %v1020_v37, %v782_v39 }
  0x17   :  { %461 = vmatpush.bf16.msra.mxu0 %v797_v29  ;;  %v913_v46 = vor.u32 %v1052_v40, %v910_v41  ;;  %v764_v47 = vld [vmem:[#allocation2 + $0x60] sm:$0xf]  ;;  %v1018_v48 = vld [vmem:[#allocation2 + $0x6c] sm:$0xf0]  ;;  %v1016_v49 = vld [vmem:[#allocation2 + $0x64] sm:$0xf]  ;;  %v909_v50 = vor.u32 %v1054_v43, %v908_v42 }
  0x18   :  { %487 = vmatpush.bf16.msra.mxu2 %v801_v33  ;;  %v766_v51 = vld [vmem:[#allocation2 + $0x70] sm:$0xf0]  ;;  %v1048_v52 = vld [vmem:[#allocation2 + $0x164] sm:$0xf]  ;;  %v892_v54 = vld [vmem:[#allocation2 + $0x160] sm:$0xf]  ;;  %v765_v56 = vor.u32 %v1018_v48, %v764_v47 }
  0x19   :  { %500 = vmatpush.bf16.msra.mxu3 %v929_v34  ;;  %474 = vmatpush.bf16.msra.mxu1 %v925_v38  ;;  %v894_v53 = vld [vmem:[#allocation2 + $0x170] sm:$0xf0]  ;;  %v1050_v55 = vld [vmem:[#allocation2 + $0x16c] sm:$0xf0]  ;;  %v769_v57 = vor.u32 %v1016_v49, %v766_v51  ;;  %v748_v59 = vld [vmem:[#allocation2 + $0x40] sm:$0xf] }
  0x1a   :  { %v897_v58 = vor.u32 %v1048_v52, %v894_v53  ;;  %v1014_v60 = vld [vmem:[#allocation2 + $0x4c] sm:$0xf0]  ;;  %v1012_v61 = vld [vmem:[#allocation2 + $0x44] sm:$0xf]  ;;  %v893_v62 = vor.u32 %v1050_v55, %v892_v54  ;;  %v750_v63 = vld [vmem:[#allocation2 + $0x50] sm:$0xf0] }
  0x1b   :  { %462 = vmatpush.bf16.msra.mxu0 %v781_v44  ;;  %v1044_v0 = vld [vmem:[#allocation2 + $0x144] sm:$0xf]  ;;  %v878_v1 = vld [vmem:[#allocation2 + $0x150] sm:$0xf0]  ;;  %v876_v2 = vld [vmem:[#allocation2 + $0x140] sm:$0xf]  ;;  %v749_v4 = vor.u32 %v1014_v60, %v748_v59  ;;  %v753_v5 = vor.u32 %v1012_v61, %v750_v63 }
  0x1c   :  { %488 = vmatpush.bf16.msra.mxu2 %v785_v45  ;;  %v1046_v3 = vld [vmem:[#allocation2 + $0x14c] sm:$0xf0]  ;;  %v881_v6 = vor.u32 %v1044_v0, %v878_v1  ;;  %v732_v7 = vld [vmem:[#allocation2 + $0x20] sm:$0xf]  ;;  %v1008_v9 = vld [vmem:[#allocation2 + $0x24] sm:$0xf] }
  0x1d   :  { %501 = vmatpush.bf16.msra.mxu3 %v913_v46  ;;  %475 = vmatpush.bf16.msra.mxu1 %v909_v50  ;;  %v1010_v8 = vld [vmem:[#allocation2 + $0x2c] sm:$0xf0]  ;;  %v877_v10 = vor.u32 %v1046_v3, %v876_v2  ;;  %v734_v11 = vld [vmem:[#allocation2 + $0x30] sm:$0xf0]  ;;  %v1040_v12 = vld [vmem:[#allocation2 + $0x124] sm:$0xf] }
  0x1e   :  { %v862_v13 = vld [vmem:[#allocation2 + $0x130] sm:$0xf0]  ;;  %v860_v14 = vld [vmem:[#allocation2 + $0x120] sm:$0xf]  ;;  %v1042_v15 = vld [vmem:[#allocation2 + $0x12c] sm:$0xf0]  ;;  %v733_v16 = vor.u32 %v1010_v8, %v732_v7  ;;  %v737_v20 = vor.u32 %v1008_v9, %v734_v11 }
  0x1f   :  { %463 = vmatpush.bf16.msra.mxu0 %v765_v56  ;;  %v716_v17 = vld [vmem:[#allocation2] sm:$0xf]  ;;  %v1006_v18 = vld [vmem:[#allocation2 + $0xc] sm:$0xf0]  ;;  %v1004_v19 = vld [vmem:[#allocation2 + $0x4] sm:$0xf]  ;;  %v865_v21 = vor.u32 %v1040_v12, %v862_v13  ;;  %v861_v25 = vor.u32 %v1042_v15, %v860_v14 }
  0x20   :  { %489 = vmatpush.bf16.msra.mxu2 %v769_v57  ;;  %v718_v22 = vld [vmem:[#allocation2 + $0x10] sm:$0xf0]  ;;  %v1036_v23 = vld [vmem:[#allocation2 + $0x104] sm:$0xf]  ;;  %v844_v27 = vld [vmem:[#allocation2 + $0x100] sm:$0xf]  ;;  %v717_v32 = vor.u32 %v1006_v18, %v716_v17 }
  0x21   :  { %502 = vmatpush.bf16.msra.mxu3 %v897_v58  ;;  %476 = vmatpush.bf16.msra.mxu1 %v893_v62  ;;  %v57_v24 = vld [vmem:[%s1231_s0] sm:$0xff]  ;;  %v846_v26 = vld [vmem:[#allocation2 + $0x110] sm:$0xf0]  ;;  %v1038_v28 = vld [vmem:[#allocation2 + $0x10c] sm:$0xf0]  ;;  %v721_v37 = vor.u32 %v1004_v19, %v718_v22 }
  0x22   :  { %v836_v29 = vld [vmem:[#allocation2 + $0xe8] sm:$0xf]  ;;  %v1035_v30 = vld [vmem:[#allocation2 + $0xf4] sm:$0xf0]  ;;  %v1033_v31 = vld [vmem:[#allocation2 + $0xec] sm:$0xf]  ;;  %v133_v36 = vunpack.c.l.b16 %v57_v24  ;;  %v849_v38 = vor.u32 %v1036_v23, %v846_v26  ;;  %v134_v39 = vunpack.c.h.b16 %v57_v24  ;;  %v845_v40 = vor.u32 %v1038_v28, %v844_v27 }
  0x23   :  { %464 = vmatpush.bf16.msra.mxu0 %v749_v4  ;;  %v838_v33 = vld [vmem:[#allocation2 + $0xf8] sm:$0xf0]  ;;  %v1065_v34 = vld [vmem:[#allocation2 + $0x1ec] sm:$0xf]  ;;  %v837_v41 = vor.u32 %v1035_v30, %v836_v29  ;;  %v964_v42 = vld [vmem:[#allocation2 + $0x1e8] sm:$0xf] }
  0x24   :  { %490 = vmatpush.bf16.msra.mxu2 %v753_v5  ;;  %v966_v35 = vld [vmem:[#allocation2 + $0x1f8] sm:$0xf0]  ;;  %v1067_v43 = vld [vmem:[#allocation2 + $0x1f4] sm:$0xf0]  ;;  %v841_v44 = vor.u32 %v1033_v31, %v838_v33  ;;  %v820_v46 = vld [vmem:[#allocation2 + $0xc8] sm:$0xf]  ;;  %v1204_v49 = vpack.c.b16 %v133_v36, %v133_v36  ;;  %v1206_v54 = vpack.c.b16 %v134_v39, %v134_v39 }
  0x25   :  { %503 = vmatpush.bf16.msra.mxu3 %v881_v6  ;;  %477 = vmatpush.bf16.msra.mxu1 %v877_v10  ;;  %v969_v45 = vor.u32 %v1065_v34, %v966_v35  ;;  %v1031_v47 = vld [vmem:[#allocation2 + $0xd4] sm:$0xf0]  ;;  %v1029_v48 = vld [vmem:[#allocation2 + $0xcc] sm:$0xf]  ;;  %v822_v50 = vld [vmem:[#allocation2 + $0xd8] sm:$0xf0]  ;;  %v965_v53 = vor.u32 %v1067_v43, %v964_v42 }
  0x26   :  { %v1061_v51 = vld [vmem:[#allocation2 + $0x1cc] sm:$0xf]  ;;  %v950_v52 = vld [vmem:[#allocation2 + $0x1d8] sm:$0xf0]  ;;  %v821_v55 = vor.u32 %v1031_v47, %v820_v46  ;;  %v948_v56 = vld [vmem:[#allocation2 + $0x1c8] sm:$0xf]  ;;  %v825_v58 = vor.u32 %v1029_v48, %v822_v50 }
  0x27   :  { %465 = vmatpush.bf16.msra.mxu0 %v733_v16  ;;  %v1063_v57 = vld [vmem:[#allocation2 + $0x1d4] sm:$0xf0]  ;;  %v953_v59 = vor.u32 %v1061_v51, %v950_v52  ;;  %v804_v60 = vld [vmem:[#allocation2 + $0xa8] sm:$0xf]  ;;  %v1025_v62 = vld [vmem:[#allocation2 + $0xac] sm:$0xf] }
  0x28   :  { %491 = vmatpush.bf16.msra.mxu2 %v737_v20  ;;  %v1027_v61 = vld [vmem:[#allocation2 + $0xb4] sm:$0xf0]  ;;  %v806_v63 = vld [vmem:[#allocation2 + $0xb8] sm:$0xf0]  ;;  %v1057_v0 = vld [vmem:[#allocation2 + $0x1ac] sm:$0xf]  ;;  %v949_v2 = vor.u32 %v1063_v57, %v948_v56 }
  0x29   :  { %504 = vmatpush.bf16.msra.mxu3 %v865_v21  ;;  %478 = vmatpush.bf16.msra.mxu1 %v861_v25  ;;  %v934_v1 = vld [vmem:[#allocation2 + $0x1b8] sm:$0xf0]  ;;  %v805_v3 = vor.u32 %v1027_v61, %v804_v60  ;;  %v932_v4 = vld [vmem:[#allocation2 + $0x1a8] sm:$0xf]  ;;  %v1059_v5 = vld [vmem:[#allocation2 + $0x1b4] sm:$0xf0]  ;;  %v809_v6 = vor.u32 %v1025_v62, %v806_v63 }
  0x2a   :  { %v937_v7 = vor.u32 %v1057_v0, %v934_v1  ;;  %v788_v8 = vld [vmem:[#allocation2 + $0x88] sm:$0xf]  ;;  %v1023_v9 = vld [vmem:[#allocation2 + $0x94] sm:$0xf0]  ;;  %v1021_v10 = vld [vmem:[#allocation2 + $0x8c] sm:$0xf]  ;;  %v933_v14 = vor.u32 %v1059_v5, %v932_v4 }
  0x2b   :  { %466 = vmatpush.bf16.msra.mxu0 %v717_v32  ;;  %v790_v11 = vld [vmem:[#allocation2 + $0x98] sm:$0xf0]  ;;  %v1053_v12 = vld [vmem:[#allocation2 + $0x18c] sm:$0xf]  ;;  %v789_v15 = vor.u32 %v1023_v9, %v788_v8  ;;  %v916_v16 = vld [vmem:[#allocation2 + $0x188] sm:$0xf] }
  0x2c   :  { %492 = vmatpush.bf16.msra.mxu2 %v721_v37  ;;  %v918_v13 = vld [vmem:[#allocation2 + $0x198] sm:$0xf0]  ;;  %v1055_v17 = vld [vmem:[#allocation2 + $0x194] sm:$0xf0]  ;;  %v772_v18 = vld [vmem:[#allocation2 + $0x68] sm:$0xf]  ;;  %v793_v19 = vor.u32 %v1021_v10, %v790_v11 }
  0x2d   :  { %505 = vmatpush.bf16.msra.mxu3 %v849_v38  ;;  %479 = vmatpush.bf16.msra.mxu1 %v845_v40  ;;  %v921_v20 = vor.u32 %v1053_v12, %v918_v13  ;;  %v1019_v21 = vld [vmem:[#allocation2 + $0x74] sm:$0xf0]  ;;  %v1017_v22 = vld [vmem:[#allocation2 + $0x6c] sm:$0xf]  ;;  %v774_v23 = vld [vmem:[#allocation2 + $0x78] sm:$0xf0]  ;;  %v917_v26 = vor.u32 %v1055_v17, %v916_v16 }
  0x2e   :  { %467 = vmatmul.bf16.vlgmr.msra.gmra.mxu0 %v1204_v49  ;;  %v1049_v24 = vld [vmem:[#allocation2 + $0x16c] sm:$0xf]  ;;  %v902_v25 = vld [vmem:[#allocation2 + $0x178] sm:$0xf0]  ;;  %v773_v27 = vor.u32 %v1019_v21, %v772_v18  ;;  %v900_v28 = vld [vmem:[#allocation2 + $0x168] sm:$0xf]  ;;  %v777_v30 = vor.u32 %v1017_v22, %v774_v23 }
  0x2f   :  { %511 = vmatpush.bf16.msrb.mxu0 %v837_v41  ;;  %493 = vmatmul.bf16.vlgmr.msra.gmra.mxu2 %v1204_v49  ;;  %v1051_v29 = vld [vmem:[#allocation2 + $0x174] sm:$0xf0]  ;;  %v905_v31 = vor.u32 %v1049_v24, %v902_v25  ;;  %v756_v32 = vld [vmem:[#allocation2 + $0x48] sm:$0xf]  ;;  %v1013_v34 = vld [vmem:[#allocation2 + $0x4c] sm:$0xf] }
  0x30   :  { %537 = vmatpush.bf16.msrb.mxu2 %v841_v44  ;;  %506 = vmatmul.bf16.vlgmr.msra.gmra.mxu3 %v1206_v54  ;;  %v1015_v33 = vld [vmem:[#allocation2 + $0x54] sm:$0xf0]  ;;  %v758_v35 = vld [vmem:[#allocation2 + $0x58] sm:$0xf0]  ;;  %v1045_v36 = vld [vmem:[#allocation2 + $0x14c] sm:$0xf]  ;;  %v901_v38 = vor.u32 %v1051_v29, %v900_v28 }
  0x31   :  { %550 = vmatpush.bf16.msrb.mxu3 %v969_v45  ;;  %524 = vmatpush.bf16.msrb.mxu1 %v965_v53  ;;  %v886_v37 = vld [vmem:[#allocation2 + $0x158] sm:$0xf0]  ;;  %v757_v39 = vor.u32 %v1015_v33, %v756_v32  ;;  %v884_v40 = vld [vmem:[#allocation2 + $0x148] sm:$0xf]  ;;  %v1047_v41 = vld [vmem:[#allocation2 + $0x154] sm:$0xf0]  ;;  %v761_v42 = vor.u32 %v1013_v34, %v758_v35 }
  0x32   :  { %480 = vmatmul.bf16.vlgmr.msra.gmra.mxu1 %v1206_v54  ;;  %v889_v43 = vor.u32 %v1045_v36, %v886_v37  ;;  %v740_v44 = vld [vmem:[#allocation2 + $0x28] sm:$0xf]  ;;  %v1011_v45 = vld [vmem:[#allocation2 + $0x34] sm:$0xf0]  ;;  %v1009_v46 = vld [vmem:[#allocation2 + $0x2c] sm:$0xf]  ;;  %v885_v51 = vor.u32 %v1047_v41, %v884_v40 }
  0x33   :  { %512 = vmatpush.bf16.msrb.mxu0 %v821_v55  ;;  %v742_v47 = vld [vmem:[#allocation2 + $0x38] sm:$0xf0]  ;;  %v1041_v48 = vld [vmem:[#allocation2 + $0x12c] sm:$0xf]  ;;  %v741_v52 = vor.u32 %v1011_v45, %v740_v44  ;;  %v868_v53 = vld [vmem:[#allocation2 + $0x128] sm:$0xf] }
  0x34   :  { %538 = vmatpush.bf16.msrb.mxu2 %v825_v58  ;;  %v870_v50 = vld [vmem:[#allocation2 + $0x138] sm:$0xf0]  ;;  %v1043_v55 = vld [vmem:[#allocation2 + $0x134] sm:$0xf0]  ;;  %v745_v56 = vor.u32 %v1009_v46, %v742_v47  ;;  %v724_v58 = vld [vmem:[#allocation2 + $0x8] sm:$0xf] }
  0x35   :  { %551 = vmatpush.bf16.msrb.mxu3 %v953_v59  ;;  %525 = vmatpush.bf16.msrb.mxu1 %v949_v2  ;;  %v873_v57 = vor.u32 %v1041_v48, %v870_v50  ;;  %v1007_v59 = vld [vmem:[#allocation2 + $0x14] sm:$0xf0]  ;;  %v1005_v60 = vld [vmem:[#allocation2 + $0xc] sm:$0xf]  ;;  %v726_v61 = vld [vmem:[#allocation2 + $0x18] sm:$0xf0]  ;;  %v869_v0 = vor.u32 %v1043_v55, %v868_v53 }
  0x36   :  { %v1037_v62 = vld [vmem:[#allocation2 + $0x10c] sm:$0xf]  ;;  %v854_v63 = vld [vmem:[#allocation2 + $0x118] sm:$0xf0]  ;;  %v725_v1 = vor.u32 %v1007_v59, %v724_v58  ;;  %v852_v2 = vld [vmem:[#allocation2 + $0x108] sm:$0xf]  ;;  %v729_v4 = vor.u32 %v1005_v60, %v726_v61 }
  0x37   :  { %513 = vmatpush.bf16.msrb.mxu0 %v805_v3  ;;  %v1039_v3 = vld [vmem:[#allocation2 + $0x114] sm:$0xf0]  ;;  %v857_v5 = vor.u32 %v1037_v62, %v854_v63  ;;  %v122_v8 = vld [vmem:[%s1234_s3] sm:$0xf]  ;;  %v1074_v10 = vld [vmem:[#allocation4 + $0x30] sm:$0xff] }
  0x38   :  { %539 = vmatpush.bf16.msrb.mxu2 %v809_v6  ;;  %v853_v6 = vor.u32 %v1039_v3, %v852_v2  ;;  %v124_v9 = vperm.slane %v122_v8, 0  ;;  %v1073_v13 = vld [vmem:[#allocation4 + $0x28] sm:$0xff]  ;;  %v125_v16 = vperm.slane %v122_v8, 1  ;;  %v1072_v17 = vld [vmem:[#allocation4 + $0x20] sm:$0xff]  ;;  %v1071_v22 = vld [vmem:[#allocation4 + $0x18] sm:$0xff]  ;;  %v126_v41 = vperm.slane %v122_v8, 2 }
  0x39   :  { %552 = vmatpush.bf16.msrb.mxu3 %v937_v7  ;;  %526 = vmatpush.bf16.msrb.mxu1 %v933_v14  ;;  %v1075_v7 = vld [vmem:[#allocation4 + $0x38] sm:$0xff]  ;;  %v1068_v32 = vld [vmem:[#allocation4] sm:$0xff]  ;;  %v127_v44 = vperm.slane %v122_v8, 3 }
  0x3a   :  { %v604_v8 = vld [vmem:[%s1232_s1] sm:$0xff] }
  0x3b   :  { %514 = vmatpush.bf16.msrb.mxu0 %v789_v15 }
  0x3c   :  { %540 = vmatpush.bf16.msrb.mxu2 %v793_v19 }
  0x3d   :  { %553 = vmatpush.bf16.msrb.mxu3 %v921_v20  ;;  %527 = vmatpush.bf16.msrb.mxu1 %v917_v26  ;;  %v1070_v26 = vld [vmem:[#allocation4 + $0x10] sm:$0xff] }
  0x3f   :  { %515 = vmatpush.bf16.msrb.mxu0 %v773_v27 }
  0x40   :  { %541 = vmatpush.bf16.msrb.mxu2 %v777_v30  ;;  %v1069_v30 = vld [vmem:[#allocation4 + $0x8] sm:$0xff] }
  0x41   :  { %554 = vmatpush.bf16.msrb.mxu3 %v905_v31  ;;  %528 = vmatpush.bf16.msrb.mxu1 %v901_v38 }
  0x43   :  { %516 = vmatpush.bf16.msrb.mxu0 %v757_v39 }
  0x44   :  { %542 = vmatpush.bf16.msrb.mxu2 %v761_v42 }
  0x45   :  { %555 = vmatpush.bf16.msrb.mxu3 %v889_v43  ;;  %529 = vmatpush.bf16.msrb.mxu1 %v885_v51 }
  0x47   :  { %517 = vmatpush.bf16.msrb.mxu0 %v741_v52 }
  0x48   :  { %543 = vmatpush.bf16.msrb.mxu2 %v745_v56 }
  0x49   :  { %556 = vmatpush.bf16.msrb.mxu3 %v873_v57  ;;  %530 = vmatpush.bf16.msrb.mxu1 %v869_v0 }
  0x4b   :  { %518 = vmatpush.bf16.msrb.mxu0 %v725_v1 }
  0x4c   :  { %544 = vmatpush.bf16.msrb.mxu2 %v729_v4 }
  0x4d   :  { %557 = vmatpush.bf16.msrb.mxu3 %v857_v5  ;;  %531 = vmatpush.bf16.msrb.mxu1 %v853_v6 }
  0x4e   :  { %519 = vmatmul.bf16.vlgmr.msrb.gmra.mxu0 %v1204_v49 }
  0x4f   :  { %545 = vmatmul.bf16.vlgmr.msrb.gmra.mxu2 %v1204_v49  ;;  %679 = vmatpush.bf16.msra.mxu0 %v1075_v7 }
  0x50   :  { %558 = vmatmul.bf16.vlgmr.msrb.gmra.mxu3 %v1206_v54  ;;  %532 = vmatmul.bf16.vlgmr.msrb.gmra.mxu1 %v1206_v54 }
  0x53   :  { %680 = vmatpush.bf16.msra.mxu0 %v1074_v10 }
  0x57   :  { %681 = vmatpush.bf16.msra.mxu0 %v1073_v13 }
  0x5b   :  { %682 = vmatpush.bf16.msra.mxu0 %v1072_v17 }
  0x5f   :  { %683 = vmatpush.bf16.msra.mxu0 %v1071_v22 }
  0x63   :  { %684 = vmatpush.bf16.msra.mxu0 %v1070_v26 }
  0x67   :  { %685 = vmatpush.bf16.msra.mxu0 %v1069_v30 }
  0x6b   :  { %686 = vmatpush.bf16.msra.mxu0 %v1068_v32 }
  0xab   :  { %v468_v11 = vpop.f32.mrf.mxu0 }
  0xac   :  { %v469_v12 = vadd.f32 %v468_v11, %v124_v9 }
  0xaf   :  { %v481_v14 = vpop.f32.mrf.mxu1 }
  0xb0   :  { %v482_v15 = vadd.f32 %v481_v14, %v469_v12 }
  0xb2   :  { %v970_v49 = vmul.f32 -1.442695, %v482_v15  ;;  %v494_v18 = vpop.f32.mrf.mxu2  ;;  %v1082_v15 = vld [vmem:[%s1236_s5] ss:$0 sm:$0xff] }
  0xb3   :  { %v495_v54 = vadd.f32 %v494_v18, %v125_v16  ;;  %v507_v19 = vpop.f32.mrf.mxu3  ;;  %v470_v20 = vpop.f32.mrf.mxu0 }
  0xb4   :  { %1083 = vpow2.f32 %v970_v49 }
  0xb5   :  { %v508_v21 = vadd.f32 %v507_v19, %v495_v54 }
  0xb7   :  { %v483_v23 = vpop.f32.mrf.mxu1  ;;  %v971_v24 = vmul.f32 -1.442695, %v508_v21 }
  0xb9   :  { %1085 = vpow2.f32 %v971_v24 }
  0xba   :  { %v1084_v25 = vpop.eup %1083  ;;  %v496_v28 = vpop.f32.mrf.mxu2 }
  0xbb   :  { %v566_v27 = vadd.f32 1.0, %v1084_v25  ;;  %v509_v29 = vpop.f32.mrf.mxu3 }
  0xbd   :  { %1087 = vrcp.f32 %v566_v27  ;;  %vm572_vm0 = vweird.f32 %v566_v27  ;;  %v578_v46 = vand.u32 2147483648, %v566_v27  ;;  %v576_v48 = vand.u32 2147483647, %v566_v27 }
  0xbf   :  { %v1086_v31 = vpop.eup %1085  ;;  %v579_v57 = vor.u32 1.1754944e-38, %v578_v46  ;;  %vm577_vm3 = vcmp.eq.f32.partialorder %v576_v48, 8.507059e+37 }
  0xc0   :  { %v585_v33 = vadd.f32 1.0, %v1086_v31 }
  0xc2   :  { %1089 = vrcp.f32 %v585_v33  ;;  %vm591_vm4 = vweird.f32 %v585_v33  ;;  %v597_v63 = vand.u32 2147483648, %v585_v33  ;;  %v595_v1 = vand.u32 2147483647, %v585_v33 }
  0xc3   :  { %v1088_v34 = vpop.eup %1087 }
  0xc4   :  { %v568_v35 = vmul.f32 %v1088_v34, %v566_v27  ;;  %vm573_vm1 = vweird.f32 %v1088_v34  ;;  %v598_v6 = vor.u32 1.1754944e-38, %v597_v63  ;;  %vm596_vm7 = vcmp.eq.f32.partialorder %v595_v1, 8.507059e+37 }
  0xc5   :  { %vm574_vm2 = vmor %vm572_vm0, %vm573_vm1 }
  0xc6   :  { %v569_v36 = vsub.f32 1.0, %v568_v35 }
  0xc8   :  { %v1090_v37 = vpop.eup %1089  ;;  %v570_v40 = vmul.f32 %v1088_v34, %v569_v36 }
  0xc9   :  { %v587_v38 = vmul.f32 %v1090_v37, %v585_v33  ;;  %vm592_vm5 = vweird.f32 %v1090_v37 }
  0xca   :  { %v571_v45 = vadd.f32 %v1088_v34, %v570_v40  ;;  %vm593_vm6 = vmor %vm591_vm4, %vm592_vm5 }
  0xcb   :  { %v520_v39 = vpop.f32.mrf.mxu0  ;;  %v588_v42 = vsub.f32 1.0, %v587_v38 }
  0xcc   :  { %v521_v47 = vadd.f32 %v520_v39, %v126_v41  ;;  %v575_v55 = vsel %vm574_vm2, %v1088_v34, %v571_v45 }
  0xcd   :  { %v533_v43 = vpop.f32.mrf.mxu1  ;;  %v589_v50 = vmul.f32 %v1090_v37, %v588_v42  ;;  %v580_v60 = vsel %vm577_vm3, %v579_v57, %v575_v55 }
  0xce   :  { %v534_v58 = vadd.f32 %v533_v43, %v521_v47 }
  0xcf   :  { %v590_v62 = vadd.f32 %v1090_v37, %v589_v50 }
  0xd1   :  { %v594_v5 = vsel %vm593_vm6, %v1090_v37, %v590_v62 }
  0xd2   :  { %v546_v51 = vpop.f32.mrf.mxu2  ;;  %v599_v7 = vsel %vm596_vm7, %v598_v6, %v594_v5 }
  0xd3   :  { %v559_v52 = vpop.f32.mrf.mxu3  ;;  %v547_v53 = vadd.f32 %v546_v51, %v127_v44  ;;  %v522_v56 = vpop.f32.mrf.mxu0  ;;  %v605_v9 = vsub.f32 1.0, %v599_v7  ;;  %v607_v12 = vmul.f32 %v604_v8, %v599_v7 }
  0xd5   :  { %v560_v59 = vadd.f32 %v559_v52, %v547_v53  ;;  %v535_v61 = vpop.f32.mrf.mxu1 }
  0xd7   :  { %v601_v0 = vmul.f32 %v580_v60, %v560_v59 }
  0xd9   :  { %v602_v2 = vadd.f32 %v601_v0, %v534_v58 }
  0xda   :  { %v548_v3 = vpop.f32.mrf.mxu2 }
  0xdb   :  { %v561_v4 = vpop.f32.mrf.mxu3  ;;  %1091 = vtanh.f32 %v602_v2 }
  0xe1   :  { %v1092_v10 = vpop.eup %1091 }
  0xe2   :  { %v606_v11 = vmul.f32 %v1092_v10, %v605_v9 }
  0xe4   :  { %v608_v13 = vadd.f32 %v607_v12, %v606_v11 }
  0xe6   :  { %609 = vst [vmem:[%s1238_s7] sm:$0xff] %v608_v13  ;;  %v610_v14 = vpack.c.bf16 %v608_v13, %v608_v13 }
  0xe8   :  { %687 = vmatmul.bf16.vlgmr.msra.gmra.mxu0 %v610_v14 }
 0x165   :  { %v688_v16 = vpop.f32.mrf.mxu0 }
 0x166   :  { %v689_v49 = vadd.f32 %v1082_v15, %v688_v16 }
 0x168   :  { %692 = vmax.xlane.f32.xlu0 %v689_v49 }
 0x16d   :  { %v690_v17 = vpop.f32.mrf.mxu0 }
 0x1db   :  { %v693_v18 = vpop.xlane.xlu0 %692 }
 0x1dc   :  { %v694_v54 = vsub.f32 %v689_v49, %v693_v18 }
 0x1de   :  { %v695_v19 = vmul.f32 1.442695, %v694_v54 }
 0x1e0   :  { %1093 = vpow2.f32 %v695_v19 }
 0x1e6   :  { %v1094_v20 = vpop.eup %1093 }
 0x1e7   :  { %697 = vadd.xlane.f32.xlu0 %v1094_v20 }
 0x25a   :  { %v698_v21 = vpop.xlane.xlu0 %697 }
 0x25b   :  { %1095 = vlog2.f32 %v698_v21 }
 0x261   :  { %v1096_v22 = vpop.eup %1095 }
 0x262   :  { %v700_v23 = vmul.f32 0.6931472, %v1096_v22 }
 0x264   :  { %v701_v24 = vadd.f32 %v700_v23, %v693_v18 }
 0x266   :  { %v702_v25 = vsub.f32 %v689_v49, %v701_v24 }
 0x268   :  { %703 = vst [vmem:[%s1237_s6] sm:$0xff] %v702_v25 }
 0x269   :  { %712 = vsyncpa [#allocation3], 1 }
 0x26a   :  { %713 = vsyncpa [#allocation5], 1 }

</bundles_post_ra>
